<compile_context>
chip_gen: v7x
topology: tpu7x:2x2x1
jax: 0.10.0
libtpu: 0.0.40
codegen_flags: <defaults>
</compile_context>

<pallas_src>
import functools

import jax
import jax.numpy as jnp
from jax import lax
from jax.experimental import pallas as pl
from jax.experimental.pallas import tpu as pltpu


def _contrastive_loss_kernel(scale_ref, img_ref, txt_t_ref, owner_ref, loss_ref,
                             acc_t_ref, acc_i_ref, *, n_img, n_txt, t_tile,
                             use_bf16_matmul):
    # scale_ref:  SMEM (1,1) f32 holding exp(logit_scale) (pre-computed in wrapper)
    # img_ref:    VMEM (N, D)       -- resident across all grid steps
    # txt_t_ref:  VMEM (D, t_tile)  -- streamed, pre-transposed text tile
    # owner_ref:  VMEM (1, t_tile)  -- int32 owner image id per text column (-1 = pad)
    # loss_ref:   VMEM (1, 1, 1) f32 per-core partial loss (written at last inner step)
    # acc_t_ref / acc_i_ref: VMEM (1, t_tile) f32 running per-column partial sums
    t = pl.program_id(1)
    n_inner = pl.num_programs(1)

    @pl.when(t == 0)
    def _init():
        acc_t_ref[...] = jnp.zeros_like(acc_t_ref)
        acc_i_ref[...] = jnp.zeros_like(acc_i_ref)

    scale = scale_ref[0, 0]            # exp(logit_scale), hoisted to the wrapper
    img = img_ref[...]                 # [N, D]
    txt_t = txt_t_ref[...]             # [D, t_tile]

    if use_bf16_matmul and img.dtype == jnp.float32:
        img_mm = img.astype(jnp.bfloat16)
        txt_mm = txt_t.astype(jnp.bfloat16)
    else:
        img_mm, txt_mm = img, txt_t
    # Canonical [N, D] @ [D, t_tile] MXU matmul; temperature applied to the f32 result.
    logits = scale * jnp.dot(img_mm, txt_mm, preferred_element_type=jnp.float32)

    owner = owner_ref[...]                                              # [1, t_tile] i32
    row_ids = lax.broadcasted_iota(jnp.int32, (n_img, t_tile), 0)       # [N, t_tile]
    gt = row_ids == owner                                               # one compare
    valid_f = (owner >= 0).astype(jnp.float32)                          # [1, t_tile]

    # Logit of the correct (image, text) pair per text column; shared by both losses.
    correct = jnp.sum(jnp.where(gt, logits, 0.0), axis=0, keepdims=True)  # [1, t_tile]

    # ---- loss_t partial: per-column cross-entropy over the resident image axis
    #      (column j of `logits` is row j of logits_per_text).
    m = jnp.max(logits, axis=0, keepdims=True)                               # [1, t_tile]
    lse = m + jnp.log(jnp.sum(jnp.exp(logits - m), axis=0, keepdims=True))   # [1, t_tile]
    acc_t_ref[...] += (lse - correct) * valid_f

    # ---- loss_i partial: BCE-with-logits column sums (stable softplus form);
    #      the dense "- x*gt" term is folded through `correct`.
    bce_col = jnp.sum(jnp.maximum(logits, 0.0)
                      + jnp.log(1.0 + jnp.exp(-jnp.abs(logits))),
                      axis=0, keepdims=True)                                 # [1, t_tile]
    acc_i_ref[...] += (bce_col - correct) * valid_f

    @pl.when(t == n_inner - 1)
    def _finalize():
        inv_t = jnp.float32(1.0 / n_txt)
        inv_nt = jnp.float32(1.0 / (n_img * n_txt))
        total_t = jnp.sum(acc_t_ref[...], axis=1, keepdims=True)   # (1, 1)
        total_i = jnp.sum(acc_i_ref[...], axis=1, keepdims=True)   # (1, 1)
        loss2d = jnp.float32(0.5) * (total_t * inv_t + total_i * inv_nt)
        loss_ref[...] = loss2d.reshape(1, 1, 1)


def _round_up(x, m):
    return ((x + m - 1) // m) * m


def _vmem_limit_bytes():
    """Generation-aware scoped-VMEM limit (~80% of per-core physical VMEM)."""
    cap = 64 * 1024 * 1024  # conservative default: v7x physical per-TC
    try:
        info = pltpu.get_tpu_info()
        cap = int(getattr(info, "vmem_capacity_bytes", cap)) or cap
    except Exception:
        pass
    return max(32 * 1024 * 1024, (cap * 4) // 5)


def _choose_text_tile(n_img, d, n_txt, itemsize, vmem_budget_bytes):
    """Largest lane-dense (multiple-of-128) text tile whose working set fits the budget."""
    t_cap = _round_up(max(n_txt, 1), 128)
    for cand in (4096, 2048, 1024, 512, 256, 128):
        t_tile = min(cand, t_cap)
        img_b = 2 * n_img * d * itemsize        # resident image block (+ its pipeline buffer)
        txt_b = 2 * d * t_tile * itemsize       # double-buffered text stream
        own_b = 2 * 8 * t_tile * 4              # (1, t_tile) int32 owner blocks, sublane-padded
        tmp_b = 8 * n_img * t_tile * 4          # ~8 live [N, t_tile] f32 temporaries
        acc_b = 2 * 8 * t_tile * 4              # two (1, t_tile) f32 accumulators, sublane-padded
        if img_b + txt_b + own_b + tmp_b + acc_b <= vmem_budget_bytes:
            return t_tile
    return 128


def multi_text_contrastive_loss(image_features, text_features, logit_scale, *,
                                t_tile=None, use_bf16_matmul=False):
    """Pallas implementation of MultiTextContrastiveLoss.forward.

    image_features: [N, D], text_features: [5*N, D], logit_scale: scalar (pre-exp).
    Returns a scalar float32 loss.
    """
    n_img, d = image_features.shape
    n_txt, d2 = text_features.shape
    if d != d2:
        raise ValueError("feature dims of image and text features must match")
    if n_txt % n_img != 0 or n_txt // n_img != 5:
        raise ValueError("text feature count must be 5x image feature count")
    if text_features.dtype != image_features.dtype:
        text_features = text_features.astype(image_features.dtype)

    itemsize = jnp.dtype(image_features.dtype).itemsize
    vmem_limit = _vmem_limit_bytes()
    if t_tile is None:
        t_tile = _choose_text_tile(n_img, d, n_txt, itemsize,
                                   vmem_budget_bytes=(vmem_limit * 3) // 4)
    else:
        t_tile = max(128, _round_up(int(t_tile), 128))

    n_tiles = pl.cdiv(n_txt, t_tile)
    n_split = 2 if n_tiles >= 2 else 1           # megacore split of the text axis (v7x)
    n_inner = pl.cdiv(n_tiles, n_split)
    t_pad = n_split * n_inner * t_tile

    # Zero-pad the text axis; padded columns carry owner == -1 and are masked out.
    if t_pad != n_txt:
        text_features = jnp.pad(text_features, ((0, t_pad - n_txt), (0, 0)))
    # Pre-transpose once so the in-kernel matmul is canonical (no per-step RHS transpose).
    text_t = text_features.T                     # [D, t_pad], lane axis = text columns

    col = jnp.arange(t_pad, dtype=jnp.int32)
    owner = jnp.where(col < n_txt, col // 5, -1).astype(jnp.int32).reshape(1, t_pad)

    scale = jnp.exp(jnp.asarray(logit_scale, jnp.float32)).reshape(1, 1)

    kernel = functools.partial(_contrastive_loss_kernel, n_img=n_img, n_txt=n_txt,
                               t_tile=t_tile, use_bf16_matmul=use_bf16_matmul)

    partials = pl.pallas_call(
        kernel,
        out_shape=jax.ShapeDtypeStruct((n_split, 1, 1), jnp.float32),
        grid_spec=pltpu.PrefetchScalarGridSpec(
            num_scalar_prefetch=0,
            grid=(n_split, n_inner),
            in_specs=[
                pl.BlockSpec(memory_space=pltpu.MemorySpace.SMEM),       # exp(logit_scale)
                pl.BlockSpec((n_img, d), lambda c, t: (0, 0)),           # resident image block
                pl.BlockSpec((d, t_tile),                                # streamed text tile
                             lambda c, t: (0, c * n_inner + t)),
                pl.BlockSpec((1, t_tile),                                # streamed owner ids
                             lambda c, t: (0, c * n_inner + t)),
            ],
            out_specs=pl.BlockSpec((1, 1, 1), lambda c, t: (c, 0, 0)),
            scratch_shapes=[
                pltpu.VMEM((1, t_tile), jnp.float32),                    # loss_t column partials
                pltpu.VMEM((1, t_tile), jnp.float32),                    # loss_i column partials
            ],
        ),
        compiler_params=pltpu.CompilerParams(
            dimension_semantics=("parallel", "arbitrary"),
            vmem_limit_bytes=vmem_limit,
        ),
    )(scale, image_features, text_t, owner)
    # Per-core partial losses are already normalized (normalization is linear): just sum.
    return jnp.sum(partials)


def _reference_loss(image_features, text_features, logit_scale):
    """Pure-JAX reference matching the PyTorch module."""
    n = image_features.shape[0]
    t = text_features.shape[0]
    logits_per_image = jnp.exp(logit_scale) * (
        image_features.astype(jnp.float32) @ text_features.astype(jnp.float32).T)  # [N, 5N]
    logits_per_text = logits_per_image.T                                            # [5N, N]
    labels = jnp.repeat(jnp.arange(n), 5)
    lse = jax.nn.logsumexp(logits_per_text, axis=-1)
    loss_t = jnp.mean(lse - logits_per_text[jnp.arange(t), labels])
    gt = (jnp.arange(n)[:, None] == (jnp.arange(t)[None, :] // 5)).astype(jnp.float32)
    x = logits_per_image
    bce = jnp.maximum(x, 0.0) - x * gt + jnp.log1p(jnp.exp(-jnp.abs(x)))
    loss_i = jnp.mean(bce)
    return (loss_i + loss_t) / 2.0


if __name__ == "__main__":
    key = jax.random.PRNGKey(0)
    k1, k2, k3, k4 = jax.random.split(key, 4)
    # Deterministic learnable temperature init (CLIP default): log(1/0.07)
    logit_scale = jnp.float32(jnp.log(1.0 / 0.07))

    # ---- Case 1: multi-tile text axis. N=64 -> T=320; with t_tile=128 that's 3 tiles,
    #      split 2 ways (grid=(2, 2)), exercising the parallel core split, the per-core
    #      accumulators and a masked padded tail on core 1.  Also run the auto-tiled path.
    n, dfeat = 64, 128
    t = 5 * n
    img = jax.random.normal(k1, (n, dfeat), dtype=jnp.float32)
    txt = jax.random.normal(k2, (t, dfeat), dtype=jnp.float32)
    img = img / jnp.linalg.norm(img, axis=-1, keepdims=True)
    txt = txt / jnp.linalg.norm(txt, axis=-1, keepdims=True)

    ref = _reference_loss(img, txt, logit_scale)

    out = jax.block_until_ready(multi_text_contrastive_loss(img, txt, logit_scale, t_tile=128))
    assert jnp.allclose(out, ref, rtol=1e-4, atol=1e-4), (out, ref)

    out_auto = jax.block_until_ready(multi_text_contrastive_loss(img, txt, logit_scale))
    assert jnp.allclose(out_auto, ref, rtol=1e-4, atol=1e-4), (out_auto, ref)

    # ---- Case 2: small / ragged shapes (T=40 < 128) exercising the padded + masked
    #      single-tile path (owner == -1 columns).
    n2, d2 = 8, 32
    t2 = 5 * n2
    img2 = jax.random.normal(k3, (n2, d2), dtype=jnp.float32)
    txt2 = jax.random.normal(k4, (t2, d2), dtype=jnp.float32)
    img2 = img2 / jnp.linalg.norm(img2, axis=-1, keepdims=True)
    txt2 = txt2 / jnp.linalg.norm(txt2, axis=-1, keepdims=True)

    ref2 = _reference_loss(img2, txt2, logit_scale)
    out2 = jax.block_until_ready(multi_text_contrastive_loss(img2, txt2, logit_scale))
    assert jnp.allclose(out2, ref2, rtol=1e-4, atol=1e-4), (out2, ref2)

    print("KERNEL_OK")
</pallas_src>

<mosaic_0001>
module attributes {stable_mosaic.version = 11 : i64} {
  func.func @_contrastive_loss_kernel(%arg0: i32, %arg1: i32, %arg2: memref<1x1xf32, #tpu.memory_space<smem>>, %arg3: memref<64x128xf32, #tpu.memory_space<vmem>>, %arg4: memref<128x128xf32, #tpu.memory_space<vmem>>, %arg5: memref<1x128xi32, #tpu.memory_space<vmem>>, %arg6: memref<1x1x1xf32, #tpu.memory_space<vmem>>, %arg7: memref<1x128xf32, #tpu.memory_space<vmem>>, %arg8: memref<1x128xf32, #tpu.memory_space<vmem>>) attributes {dimension_semantics = [#tpu.dimension_semantics<parallel>, #tpu.dimension_semantics<arbitrary>], iteration_bounds = array<i64: 2, 2>, scalar_prefetch = 0 : i64, scratch_operands = 2 : i64, tpu.core_type = #tpu.core_type<tc>, window_params = [{transform_indices = @transform_0, window_bounds = array<i64: 1, 1>}, {pipeline_mode = #tpu.pipeline_mode<synchronous>, transform_indices = @transform_1, window_bounds = array<i64: 64, 128>}, {transform_indices = @transform_2, window_bounds = array<i64: 128, 128>}, {transform_indices = @transform_3, window_bounds = array<i64: 1, 128>}, {transform_indices = @transform_4, window_bounds = array<i64: 1, 1, 1>}]} {
    %c0_i32 = arith.constant 0 : i32
    %0 = arith.cmpi eq, %arg1, %c0_i32 : i32
    %1 = arith.extui %0 : i1 to i32
    %c0_i32_0 = arith.constant 0 : i32
    %2 = arith.cmpi ne, %1, %c0_i32_0 : i32
    scf.if %2 {
      %cst_26 = arith.constant 0.000000e+00 : f32
      %55 = vector.broadcast %cst_26 : f32 to vector<1x128xf32>
      %c0_27 = arith.constant 0 : index
      %c0_28 = arith.constant 0 : index
      %56 = vector.load %arg7[%c0_27, %c0_28] : memref<1x128xf32, #tpu.memory_space<vmem>>, vector<1x128xf32>
      tpu.vector_store %arg7[%c0_27, %c0_28], %55 {strides = array<i32>} : memref<1x128xf32, #tpu.memory_space<vmem>>, vector<1x128xf32>,
      %cst_29 = arith.constant 0.000000e+00 : f32
      %57 = vector.broadcast %cst_29 : f32 to vector<1x128xf32>
      %c0_30 = arith.constant 0 : index
      %c0_31 = arith.constant 0 : index
      %58 = vector.load %arg8[%c0_30, %c0_31] : memref<1x128xf32, #tpu.memory_space<vmem>>, vector<1x128xf32>
      tpu.vector_store %arg8[%c0_30, %c0_31], %57 {strides = array<i32>} : memref<1x128xf32, #tpu.memory_space<vmem>>, vector<1x128xf32>,
    } else {
    }
    %c0 = arith.constant 0 : index
    %c0_1 = arith.constant 0 : index
    %3 = memref.load %arg2[%c0, %c0_1] : memref<1x1xf32, #tpu.memory_space<smem>>
    %c0_2 = arith.constant 0 : index
    %c0_3 = arith.constant 0 : index
    %4 = vector.load %arg3[%c0_2, %c0_3] : memref<64x128xf32, #tpu.memory_space<vmem>>, vector<64x128xf32>
    %c0_4 = arith.constant 0 : index
    %c0_5 = arith.constant 0 : index
    %5 = vector.load %arg4[%c0_4, %c0_5] : memref<128x128xf32, #tpu.memory_space<vmem>>, vector<128x128xf32>
    %cst = arith.constant dense<0.000000e+00> : vector<64x128xf32>
    %6 = tpu.matmul %4, %5, %cst {dimension_numbers = #tpu.dot_dimension_numbers<[1], [0], [0], [1], [0, 0, 1, 1], [], []>} : vector<64x128xf32>, vector<128x128xf32>, vector<64x128xf32> -> vector<64x128xf32>
    %7 = vector.broadcast %3 : f32 to vector<64x128xf32>
    %8 = arith.mulf %7, %6 : vector<64x128xf32>
    %c0_6 = arith.constant 0 : index
    %c0_7 = arith.constant 0 : index
    %9 = vector.load %arg5[%c0_6, %c0_7] : memref<1x128xi32, #tpu.memory_space<vmem>>, vector<1x128xi32>
    %10 = tpu.iota {dimensions = array<i32: 0>} : vector<64x128xi32>
    %11 = vector.broadcast %9 : vector<1x128xi32> to vector<64x128xi32>
    %12 = arith.cmpi eq, %10, %11 : vector<64x128xi32>
    %c0_i32_8 = arith.constant 0 : i32
    %13 = vector.broadcast %c0_i32_8 : i32 to vector<1x128xi32>
    %14 = arith.cmpi sge, %9, %13 : vector<1x128xi32>
    %15 = arith.extui %14 : vector<1x128xi1> to vector<1x128xi32>
    %16 = arith.sitofp %15 : vector<1x128xi32> to vector<1x128xf32>
    %cst_9 = arith.constant 0.000000e+00 : f32
    %17 = vector.broadcast %cst_9 : f32 to vector<64x128xf32>
    %18 = arith.select %12, %8, %17 : vector<64x128xi1>, vector<64x128xf32>
    %cst_10 = arith.constant dense<0.000000e+00> : vector<128xf32>
    %19 = vector.multi_reduction <add>, %18, %cst_10 [0] : vector<64x128xf32> to vector<128xf32>
    %20 = vector.shape_cast %19 : vector<128xf32> to vector<1x128xf32>
    %cst_11 = arith.constant dense<0xFF800000> : vector<128xf32>
    %21 = vector.multi_reduction <maximumf>, %8, %cst_11 [0] : vector<64x128xf32> to vector<128xf32>
    %22 = vector.shape_cast %21 : vector<128xf32> to vector<1x128xf32>
    %23 = vector.broadcast %22 : vector<1x128xf32> to vector<64x128xf32>
    %24 = arith.subf %8, %23 : vector<64x128xf32>
    %25 = math.exp %24 : vector<64x128xf32>
    %cst_12 = arith.constant dense<0.000000e+00> : vector<128xf32>
    %26 = vector.multi_reduction <add>, %25, %cst_12 [0] : vector<64x128xf32> to vector<128xf32>
    %27 = vector.shape_cast %26 : vector<128xf32> to vector<1x128xf32>
    %28 = math.log %27 : vector<1x128xf32>
    %29 = arith.addf %22, %28 : vector<1x128xf32>
    %c0_13 = arith.constant 0 : index
    %c0_14 = arith.constant 0 : index
    %30 = vector.load %arg7[%c0_13, %c0_14] : memref<1x128xf32, #tpu.memory_space<vmem>>, vector<1x128xf32>
    %31 = arith.subf %29, %20 : vector<1x128xf32>
    %32 = arith.mulf %31, %16 : vector<1x128xf32>
    %33 = arith.addf %30, %32 : vector<1x128xf32>
    %c0_15 = arith.constant 0 : index
    %c0_16 = arith.constant 0 : index
    %34 = vector.load %arg7[%c0_15, %c0_16] : memref<1x128xf32, #tpu.memory_space<vmem>>, vector<1x128xf32>
    tpu.vector_store %arg7[%c0_15, %c0_16], %33 {strides = array<i32>} : memref<1x128xf32, #tpu.memory_space<vmem>>, vector<1x128xf32>,
    %cst_17 = arith.constant 0.000000e+00 : f32
    %35 = vector.broadcast %cst_17 : f32 to vector<64x128xf32>
    %36 = arith.maximumf %8, %35 : vector<64x128xf32>
    %37 = math.absf %8 : vector<64x128xf32>
    %cst_18 = arith.constant 0.000000e+00 : f32
    %38 = vector.broadcast %cst_18 : f32 to vector<64x128xf32>
    %39 = arith.subf %38, %37 : vector<64x128xf32>
    %40 = math.exp %39 : vector<64x128xf32>
    %cst_19 = arith.constant 1.000000e+00 : f32
    %41 = vector.broadcast %cst_19 : f32 to vector<64x128xf32>
    %42 = arith.addf %41, %40 : vector<64x128xf32>
    %43 = math.log %42 : vector<64x128xf32>
    %44 = arith.addf %36, %43 : vector<64x128xf32>
    %cst_20 = arith.constant dense<0.000000e+00> : vector<128xf32>
    %45 = vector.multi_reduction <add>, %44, %cst_20 [0] : vector<64x128xf32> to vector<128xf32>
    %46 = vector.shape_cast %45 : vector<128xf32> to vector<1x128xf32>
    %c0_21 = arith.constant 0 : index
    %c0_22 = arith.constant 0 : index
    %47 = vector.load %arg8[%c0_21, %c0_22] : memref<1x128xf32, #tpu.memory_space<vmem>>, vector<1x128xf32>
    %48 = arith.subf %46, %20 : vector<1x128xf32>
    %49 = arith.mulf %48, %16 : vector<1x128xf32>
    %50 = arith.addf %47, %49 : vector<1x128xf32>
    %c0_23 = arith.constant 0 : index
    %c0_24 = arith.constant 0 : index
    %51 = vector.load %arg8[%c0_23, %c0_24] : memref<1x128xf32, #tpu.memory_space<vmem>>, vector<1x128xf32>
    tpu.vector_store %arg8[%c0_23, %c0_24], %50 {strides = array<i32>} : memref<1x128xf32, #tpu.memory_space<vmem>>, vector<1x128xf32>,
    %c1_i32 = arith.constant 1 : i32
    %52 = arith.cmpi eq, %arg1, %c1_i32 : i32
    %53 = arith.extui %52 : i1 to i32
    %c0_i32_25 = arith.constant 0 : i32
    %54 = arith.cmpi ne, %53, %c0_i32_25 : i32
    scf.if %54 {
      %c0_26 = arith.constant 0 : index
      %c0_27 = arith.constant 0 : index
      %55 = vector.load %arg7[%c0_26, %c0_27] : memref<1x128xf32, #tpu.memory_space<vmem>>, vector<1x128xf32>
      %cst_28 = arith.constant dense<0.000000e+00> : vector<1xf32>
      %56 = vector.multi_reduction <add>, %55, %cst_28 [1] : vector<1x128xf32> to vector<1xf32>
      %57 = vector.shape_cast %56 : vector<1xf32> to vector<1x1xf32>
      %c0_29 = arith.constant 0 : index
      %c0_30 = arith.constant 0 : index
      %58 = vector.load %arg8[%c0_29, %c0_30] : memref<1x128xf32, #tpu.memory_space<vmem>>, vector<1x128xf32>
      %cst_31 = arith.constant dense<0.000000e+00> : vector<1xf32>
      %59 = vector.multi_reduction <add>, %58, %cst_31 [1] : vector<1x128xf32> to vector<1xf32>
      %60 = vector.shape_cast %59 : vector<1xf32> to vector<1x1xf32>
      %cst_32 = arith.constant 3.125000e-03 : f32
      %61 = vector.broadcast %cst_32 : f32 to vector<1x1xf32>
      %62 = arith.mulf %57, %61 : vector<1x1xf32>
      %cst_33 = arith.constant 4.88281257E-5 : f32
      %63 = vector.broadcast %cst_33 : f32 to vector<1x1xf32>
      %64 = arith.mulf %60, %63 : vector<1x1xf32>
      %65 = arith.addf %62, %64 : vector<1x1xf32>
      %cst_34 = arith.constant 5.000000e-01 : f32
      %66 = vector.broadcast %cst_34 : f32 to vector<1x1xf32>
      %67 = arith.mulf %66, %65 : vector<1x1xf32>
      %68 = vector.shape_cast %67 : vector<1x1xf32> to vector<1x1x1xf32>
      %c0_35 = arith.constant 0 : index
      %c0_36 = arith.constant 0 : index
      %c0_37 = arith.constant 0 : index
      %69 = vector.load %arg6[%c0_35, %c0_36, %c0_37] : memref<1x1x1xf32, #tpu.memory_space<vmem>>, vector<1x1x1xf32>
      tpu.vector_store %arg6[%c0_35, %c0_36, %c0_37], %68 {strides = array<i32>} : memref<1x1x1xf32, #tpu.memory_space<vmem>>, vector<1x1x1xf32>,
    } else {
    }
    return
  }
  func.func @transform_0(%arg0: i32, %arg1: i32) -> (i32, i32) {
    %c0_i32 = arith.constant 0 : i32
    %c0_i32_0 = arith.constant 0 : i32
    %c0_i32_1 = arith.constant 0 : i32
    return %c0_i32, %c0_i32_0 : i32, i32
  }
  func.func @transform_1(%arg0: i32, %arg1: i32) -> (i32, i32) {
    %c0_i32 = arith.constant 0 : i32
    %c0_i32_0 = arith.constant 0 : i32
    %c0_i32_1 = arith.constant 0 : i32
    return %c0_i32, %c0_i32_0 : i32, i32
  }
  func.func @transform_2(%arg0: i32, %arg1: i32) -> (i32, i32) {
    %c2_i32 = arith.constant 2 : i32
    %0 = arith.muli %arg0, %c2_i32 : i32
    %1 = arith.addi %0, %arg1 : i32
    %c0_i32 = arith.constant 0 : i32
    %c0_i32_0 = arith.constant 0 : i32
    return %c0_i32, %1 : i32, i32
  }
  func.func @transform_3(%arg0: i32, %arg1: i32) -> (i32, i32) {
    %c2_i32 = arith.constant 2 : i32
    %0 = arith.muli %arg0, %c2_i32 : i32
    %1 = arith.addi %0, %arg1 : i32
    %c0_i32 = arith.constant 0 : i32
    %c0_i32_0 = arith.constant 0 : i32
    return %c0_i32, %1 : i32, i32
  }
  func.func @transform_4(%arg0: i32, %arg1: i32) -> (i32, i32, i32) {
    %c0_i32 = arith.constant 0 : i32
    %c0_i32_0 = arith.constant 0 : i32
    %c0_i32_1 = arith.constant 0 : i32
    return %arg0, %c0_i32, %c0_i32_0 : i32, i32, i32
  }
}

</mosaic_0001>

<bundles_post_ra>
// kernel: tpu_custom_call.1
= control target key start
LH: loop header
LB: loop body
LE: loop exit
PB: predicated region body
PF: predicated region fallthrough
CT: control target
= control target key end

     0   :  { %s1500_s0 = inlined_call_operand.<no memory space> [shape: f32[1,1], index: 0, kind: input, shape index: {}]   ;;  %s1501_s1 = inlined_call_operand.hbm [shape: f32[64,128], index: 1, kind: input, shape index: {}]   ;;  %s1502_s2 = inlined_call_operand.hbm [shape: f32[128,512], index: 2, kind: input, shape index: {}]   ;;  %s1503_s3 = inlined_call_operand.vmem [shape: s32[1,512], index: 3, kind: input, shape index: {}]   ;;  %s1504_s4 = inlined_call_operand.vmem [shape: f32[2,1,1], index: 4, kind: output, shape index: {}]  }
   0x1   :  { %9 = sst [smem:[#allocation4]] %s1500_s0 }
   0x2   :  { %10 = vsyncpa [#allocation6], 0 }
   0x3   :  { %11 = vsyncpa [#allocation8], 0 }
   0x4   :  { %13 = vsyncpa [#allocation8 + $0x1], 0  ;;  %s1167_s17 = smov 0   ;;  %s1169_s18 = smov 0  }
   0x5   :  { %s1171_s19 = smov 0   ;;  %s1173_s20 = smov 0  }
   0x6   :  { %s1175_s21 = smov 0   ;;  %s1177_s22 = smov 0  }
   0x7   :  { %s1179_s23 = smov 0   ;;  %s1181_s24 = smov 0  }
   0x8 LB: > { %s728_s0 = sadd.s32 4294967295, %s1130_s24   ;;  %p91_p0 = scmp.ne.s32.totalorder %s1110_s19, %s1106_s18  ;;  %s1130_s24 = sphi %s1181_s24, %s19_s24   ;;  %s1126_s23 = sphi %s1179_s23, %s1528_s23   ;;  %s1122_s22 = sphi %s1177_s22, %s1527_s22   ;;  %s1118_s21 = sphi %s1175_s21, %s1526_s21   ;;  %s1114_s20 = sphi %s1173_s20, %s1525_s20   ;;  %s1110_s19 = sphi %s1171_s19, %s1524_s19   ;;  %s1106_s18 = sphi %s1169_s18, %s1523_s18   ;;  %s1102_s17 = sphi %s1167_s17, %s1522_s17  }
   0x9   : > { %p92_p1 = scmp.eq.s32.totalorder %s1130_s24, 0  ;;  %p97_p2 = scmp.ne.s32.totalorder %s1106_s18, %s1102_s17 }
   0xa   : > { %p1210_p3 = scmp.eq.s32.totalorder %s728_s0, 0  ;;  %p734_p4 = scmp.ge.s32.totalorder %s1130_s24, 1 }
   0xb   : > { %p93_p5 = por %p92_p1, %p91_p0  ;;  %p164_p6 = scmp.lt.s32.totalorder %s1130_s24, 5 }
   0xc   : > { %s1511_s25 = scalar_select %p1210_p3, 1, 0 }
   0xd   : > { %p1218_p7 = por %p1210_p3, %p97_p2  ;;  %p1222_p8 = pnand %p734_p4, %p164_p6 }
   0xe   : > { %s1132_s28 = smov [#allocation5]   ;;  %p880_p11 = scmp.lt.s32.totalorder %s1130_s24, 4 }
   0xf   : > { %s1512_s26 = scalar_select %p1218_p7, 1, 0 }
  0x10   : > { %s1513_s27 = scalar_select %p1222_p8, 1, 0 }
  0x11   : > { %s179_s29 = sshll.u32 %s1132_s28, 4  ;;  %p871_p9 = pneg %p1222_p8  ;;  %s180_s29 = int_to_ptr.vmem [resolvable:$true] %s179_s29 }
  0x12   : > { %p1235_p12 = pnand %p880_p11, %p93_p5  ;;  %s1002_s8 = scalar_lea.hbm %s1501_s1, 1024 }
  0x13   : > { %p1230_p10 = pnand %p871_p9, %p1210_p3  ;;  %p1003_p13 = scmp.ne.s32.totalorder %s1501_s1, %s1002_s8 }
  0x14   : > { %s1515_s5 = scalar_select %p1235_p12, 1, 0 }
  0x15   : > { %p1004_p0 = pneg %p1230_p10  ;;  %p1009_p4 = scmp.lt.u32.totalorder %s1002_s8, %s1501_s1 }
  0x17   : > { %p1005_p1 = pnand %p1004_p0, %p1003_p13 }
  0x19   : > { %p1006_p2 = pneg %p1005_p1 }
  0x1b   : > { %p1011_p5 = pnand %p1009_p4, %p1006_p2 }
  0x1d   : > { %1014 = shalt.err (!%p1011_p5)
}
  0x1e   : > { %s1015_s13 = scalar_lea.vmem %s180_s29, 1024  ;;  %p1023_p7 = scmp.lt.s32.totalorder %s180_s29, %s180_s29 }
  0x1f   : > { %p1016_p6 = scmp.ne.s32.totalorder %s180_s29, %s1015_s13  ;;  %p1024_p3 = scmp.lt.s32.totalorder %s1015_s13, %s1015_s13 }
  0x21   : > { %p1018_p9 = pnand %p1016_p6, %p1004_p0  ;;  %p1025_p8 = por %p1024_p3, %p1023_p7 }
  0x23   : > { %p1019_p11 = pneg %p1018_p9 }
  0x25   : > { %p1026_p12 = pnand %p1025_p8, %p1019_p11 }
  0x27   : > { %1029 = shalt.err (!%p1026_p12)
}
  0x28   : > { %s1510_s14 = smov 128   ;;  %s1134_s15 = smov 8  }
  0x29   : > { %874 = dma.hbm_to_vmem [thread:$0]  (!%p1230_p10), %s1501_s1, 1024, %s180_s29, [#allocation6], %s1510_s14, %s1510_s14, %s1134_s15  }
  0x2a   : > { %s28_s0 = sadd.s32 1, %s1122_s22  ;;  %s730_s28 = sshll.u32 %s1126_s23, 1 }
  0x2b   : > { %p29_p3 = scmp.ge.s32.totalorder %s28_s0, 2  ;;  %s31_s6 = sadd.s32 1, %s1126_s23 }
  0x2c   : > { %s78_s7 = sadd.s32 %s1122_s22, %s730_s28  ;;  %s193_s8 = sand.u32 1, %s1110_s19  }
  0x2d   : > { %s1530_s0 = smov (%p29_p3, %s28_s0), 0  ;;  %s1532_s6 = smov (!%p29_p3, %s31_s6), %s1126_s23 }
  0x2e   : > { %s737_s9 = sshll.u32 %s193_s8, 7  ;;  %p33_p7 = scmp.ge.s32.totalorder %s1532_s6, 2 }
  0x2f   : > { %s739_s30 = sshll.u32 %s78_s7, 7  ;;  %s197_s10 = scalar_lea.vmem [#allocation7], %s737_s9 }
  0x30   : > { %s205_s11 = sshll.u32 %s197_s10, 4  ;;  %s1534_s6 = smov (%p33_p7, %s1532_s6), 0  ;;  %s1274_s11 = int_to_ptr.vmem [resolvable:$true] %s205_s11 }
  0x31   : > { %s1271_s13 = scalar_lea.hbm %s1502_s2, %s739_s30  ;;  %s731_s16 = sshll.u32 %s1534_s6, 1 }
  0x32   : > { %s80_s17 = sadd.s32 %s731_s16, %s1530_s0  ;;  %s84_s14 = sadd.s32 1, %s1110_s19 }
  0x33   : > { %s81_s28 = ssub.s32 %s78_s7, %s80_s17  ;;  %s1282_s10 = scalar_lea.sflag [#allocation8], %s193_s8 }
  0x34   : > { %p1278_p8 = scmp.eq.s32.totalorder %s81_s28, 0  ;;  %s1030_s29 = scalar_lea.hbm %s1271_s13, 2048 }
  0x35   : > { %p1031_p10 = scmp.ne.s32.totalorder %s1271_s13, %s1030_s29  ;;  %p1517_p12 = scmp.ne.s32.totalorder %s1515_s5, 0 }
  0x36   : > { %s1035_s16 = scalar_lea.hbm %s1502_s2, 8192  ;;  %p1036_p2 = scmp.lt.u32.totalorder %s1271_s13, %s1502_s2 }
  0x37   : > { %p1032_p13 = pneg %p1517_p12  ;;  %p1037_p4 = scmp.lt.u32.totalorder %s1035_s16, %s1030_s29 }
  0x38   : > { %p1039_p6 = scmp.lt.u32.totalorder %s1030_s29, %s1271_s13 }
  0x39   : > { %p1033_p0 = pnand %p1032_p13, %p1031_p10  ;;  %p1038_p5 = por %p1037_p4, %p1036_p2 }
  0x3b   : > { %p1034_p1 = pneg %p1033_p0  ;;  %p1040_p9 = por %p1039_p6, %p1038_p5 }
  0x3d   : > { %p1041_p11 = pnand %p1040_p9, %p1034_p1 }
  0x3f   : > { %1044 = shalt.err (!%p1041_p11)
}
  0x40   : > { %s1045_s8 = scalar_lea.vmem %s1274_s11, 2048  ;;  %s1135_s28 = smov [#allocation7]  }
  0x41   : > { %p1046_p3 = scmp.ne.s32.totalorder %s1274_s11, %s1045_s8  ;;  %s1050_s30 = sshll.u32 %s1135_s28, 4  ;;  %s1051_s30 = int_to_ptr.vmem [resolvable:$false] %s1050_s30 }
  0x42   : > { %s1052_s12 = scalar_lea.vmem %s1051_s30, 4096  ;;  %p1053_p0 = scmp.lt.s32.totalorder %s1274_s11, %s1051_s30 }
  0x43   : > { %p1048_p7 = pnand %p1046_p3, %p1032_p13  ;;  %p1054_p2 = scmp.lt.s32.totalorder %s1052_s12, %s1045_s8 }
  0x45   : > { %p1049_p10 = pneg %p1048_p7  ;;  %p1055_p4 = por %p1054_p2, %p1053_p0 }
  0x47   : > { %p1056_p5 = pnand %p1055_p4, %p1049_p10 }
  0x49   : > { %1059 = shalt.err (!%p1056_p5)
}
  0x4a   : > { %s1136_s29 = smov 512   ;;  %s1518_s16 = smov 128  }
  0x4b   : > { %878 = dma.hbm_to_vmem [thread:$0]  (!%p1517_p12), %s1271_s13, 2048, %s1274_s11, %s1282_s10, %s1136_s29, %s1518_s16, %s1134_s15  }
  0x4c   : > { %s1317_s7 = scalar_select %p1278_p8, %s1110_s19, %s84_s14  }
  0x4d   : > { %p1519_p13 = scmp.ne.s32.totalorder %s1513_s27, 0 }
  0x4e   : > { %p1520_p1 = scmp.ne.s32.totalorder (!%p1519_p13), %s1511_s25, 0 }
  0x4f   : > { %227 = sbr.rel (%p1519_p13) target bundleno = 601 (0x259), region = 36 }
  0x56   : > { %1093 = dma.done.wait (%p1520_p1), [#allocation6], 1024  }
  0x57   : > { %1095 = vsyncadd (%p1520_p1), [#allocation6], 4294966272  ;;  %s233_s5 = sand.u32 1, %s1106_s18   ;;  %p1521_p12 = scmp.ne.s32.totalorder %s1512_s26, 0 }
  0x58   : > { %s742_s17 = sshll.u32 %s233_s5, 7  ;;  %s234_s8 = scalar_lea.sflag [#allocation8], %s233_s5 }
  0x59   : > { %s1326_s28 = scalar_lea.vmem [#allocation7], %s742_s17 }
  0x5a   : > { %1097 = dma.done.wait (%p1521_p12), %s234_s8, 2048  }
  0x5b   : > { %1099 = vsyncadd (%p1521_p12), %s234_s8, 4294965248  ;;  %s743_s27 = sshll.u32 %s1118_s21, 1  ;;  %p274_p8 = scmp.lt.s32.totalorder %s1118_s21, 1 }
  0x5c   : > { %s268_s25 = sadd.s32 %s1114_s20, %s743_s27  ;;  %p744_p9 = scmp.ne.s32.totalorder %s1114_s20, 0 }
  0x5d   : > { %p269_p6 = scmp.lt.s32.totalorder %s268_s25, 3  ;;  %s1536_s21 = smov (!%p274_p8, %s1118_s21), 1  ;;  %v1137_v0 = vmov (!%p744_p9), 0.0  }
  0x5e   : > { %s276_s11 = scalar_lea.vmem %s1504_s4, %s1536_s21  ;;  %280 = sbr.rel (%p744_p9) target bundleno = 101 (0x65), region = 48  ;;  %281 = vst [vmem:[#allocation2] sm:$0x1] (!%p744_p9), %v1137_v0  ;;  %282 = vst [vmem:[#allocation3] sm:$0x1] (!%p744_p9), %v1137_v0 }
  0x5f   : > { %s1538_s25 = smov (!%p269_p6, %s268_s25), 3 }
  0x60   : > { %s271_s9 = scalar_lea.vmem %s1503_s3, %s1538_s25 }
  0x65 PF: > { %v292_v1 = vld [vmem:[%s1326_s28] sm:$0xff]  ;;  %v293_v2 = vld [vmem:[%s1326_s28 + $0x8] sm:$0xff]  ;;  %v294_v3 = vld [vmem:[%s1326_s28 + $0x10] sm:$0xff]  ;;  %v423_v33 = vlaneseq  ;;  %s283_s10 = sld [smem:[#allocation4]]  ;;  %p746_p11 = scmp.ne.s32.totalorder %s1114_s20, 1 }
  0x66   : > { %v817_v4 = vpack.c.bf16 %v293_v2, %v292_v1  ;;  %v295_v5 = vld [vmem:[%s1326_s28 + $0x18] sm:$0xff]  ;;  %v296_v7 = vld [vmem:[%s1326_s28 + $0x20] sm:$0xff]  ;;  %v297_v8 = vld [vmem:[%s1326_s28 + $0x28] sm:$0xff]  ;;  %vm621_vm9 = vcmask (!%p746_p11), 1040384   ;;  %vm633_vm10 = vcmask (!%p746_p11), 0  }
  0x67   : > { %v821_v6 = vpack.c.bf16 %v295_v5, %v294_v3  ;;  %v825_v9 = vpack.c.bf16 %v297_v8, %v296_v7  ;;  %v284_v10 = vld [vmem:[#allocation5] sm:$0xff]  ;;  %v298_v12 = vld [vmem:[%s1326_s28 + $0x30] sm:$0xff]  ;;  %v299_v13 = vld [vmem:[%s1326_s28 + $0x38] sm:$0xff]  ;;  %v1365_v34 = vshrl.u32 %v423_v33, 7 }
  0x68   : > { %818 = vmatprep.subr.bf16.mxu0 %v817_v4  ;;  %849 = vmatprep.subr.bf16.mxu1 %v817_v4  ;;  %v288_v11 = vld [vmem:[#allocation5 + $0x20] sm:$0xff]  ;;  %v829_v14 = vpack.c.bf16 %v299_v13, %v298_v12  ;;  %v301_v16 = vld [vmem:[%s1326_s28 + $0x48] sm:$0xff]  ;;  %v302_v18 = vld [vmem:[%s1326_s28 + $0x50] sm:$0xff] }
  0x69   : > { %820 = vmatpush3.bf16.msra.mxu0 %v817_v4  ;;  %857 = vmatpush3.bf16.msra.mxu1 %v817_v4  ;;  %v300_v15 = vld [vmem:[%s1326_s28 + $0x40] sm:$0xff]  ;;  %v303_v19 = vld [vmem:[%s1326_s28 + $0x58] sm:$0xff]  ;;  %v305_v22 = vld [vmem:[%s1326_s28 + $0x68] sm:$0xff]  ;;  %v434_v35 = vsub.s32 0, %v1365_v34  ;;  %v425_v37 = vadd.s32 8, %v1365_v34  ;;  %v426_v55 = vadd.s32 16, %v1365_v34 }
  0x6a   : > { %822 = vmatprep.subr.bf16.mxu0 %v821_v6  ;;  %850 = vmatprep.subr.bf16.mxu1 %v821_v6  ;;  %v833_v17 = vpack.c.bf16 %v301_v16, %v300_v15  ;;  %v837_v20 = vpack.c.bf16 %v303_v19, %v302_v18  ;;  %v304_v21 = vld [vmem:[%s1326_s28 + $0x60] sm:$0xff]  ;;  %v306_v24 = vld [vmem:[%s1326_s28 + $0x70] sm:$0xff]  ;;  %v307_v25 = vld [vmem:[%s1326_s28 + $0x78] sm:$0xff]  ;;  %v429_v57 = vadd.s32 40, %v1365_v34  ;;  %v428_v63 = vadd.s32 32, %v1365_v34 }
  0x6b   : > { %805 = vmatprep.mubr.f32.mxu0 %v284_v10  ;;  %811 = vmatprep.mubr.f32.mxu1 %v288_v11  ;;  %v841_v23 = vpack.c.bf16 %v305_v22, %v304_v21  ;;  %v845_v26 = vpack.c.bf16 %v307_v25, %v306_v24  ;;  %v285_v27 = vld [vmem:[#allocation5 + $0x8] sm:$0xff]  ;;  %v286_v29 = vld [vmem:[#allocation5 + $0x10] sm:$0xff]  ;;  %v287_v31 = vld [vmem:[#allocation5 + $0x18] sm:$0xff]  ;;  %v413_v39 = vstv %s283_s10  ;;  %v427_v1 = vadd.s32 24, %v1365_v34 }
  0x6c   : > { %v289_v28 = vld [vmem:[#allocation5 + $0x28] sm:$0xff]  ;;  %v290_v30 = vld [vmem:[#allocation5 + $0x30] sm:$0xff]  ;;  %v291_v32 = vld [vmem:[#allocation5 + $0x38] sm:$0xff] }
  0x6d   : > { %824 = vmatpush3.bf16.msra.mxu0 %v821_v6  ;;  %858 = vmatpush3.bf16.msra.mxu1 %v821_v6  ;;  %v1373_v36 = vld [vmem:[%s271_s9] sm:$0x1] }
  0x6e   : > { %826 = vmatprep.subr.bf16.mxu0 %v825_v9  ;;  %851 = vmatprep.subr.bf16.mxu1 %v825_v9  ;;  %v1377_v38 = vrot.slane %v1373_v36, %v434_v35  ;;  %vm444_vm8 = vcmp.ge.s32.totalorder %v1373_v36, 0 }
  0x70   : > { %vm437_vm0 = vcmp.eq.s32.totalorder %v425_v37, %v1377_v38  ;;  %vm436_vm1 = vcmp.eq.s32.totalorder %v1365_v34, %v1377_v38  ;;  %vm438_vm2 = vcmp.eq.s32.totalorder %v426_v55, %v1377_v38  ;;  %vm441_vm3 = vcmp.eq.s32.totalorder %v429_v57, %v1377_v38 }
  0x71   : > { %828 = vmatpush3.bf16.msra.mxu0 %v825_v9  ;;  %859 = vmatpush3.bf16.msra.mxu1 %v825_v9  ;;  %vm439_vm4 = vcmp.eq.s32.totalorder %v427_v1, %v1377_v38  ;;  %vm440_vm5 = vcmp.eq.s32.totalorder %v428_v63, %v1377_v38 }
  0x72   : > { %830 = vmatprep.subr.bf16.mxu0 %v829_v14  ;;  %852 = vmatprep.subr.bf16.mxu1 %v829_v14 }
  0x75   : > { %832 = vmatpush3.bf16.msra.mxu0 %v829_v14  ;;  %860 = vmatpush3.bf16.msra.mxu1 %v829_v14 }
  0x76   : > { %834 = vmatprep.subr.bf16.mxu0 %v833_v17  ;;  %853 = vmatprep.subr.bf16.mxu1 %v833_v17 }
  0x79   : > { %836 = vmatpush3.bf16.msra.mxu0 %v833_v17  ;;  %861 = vmatpush3.bf16.msra.mxu1 %v833_v17  ;;  %v430_v17 = vadd.s32 48, %v1365_v34 }
  0x7a   : > { %838 = vmatprep.subr.bf16.mxu0 %v837_v20  ;;  %854 = vmatprep.subr.bf16.mxu1 %v837_v20 }
  0x7b   : > { %vm442_vm6 = vcmp.eq.s32.totalorder %v430_v17, %v1377_v38 }
  0x7d   : > { %840 = vmatpush3.bf16.msra.mxu0 %v837_v20  ;;  %862 = vmatpush3.bf16.msra.mxu1 %v837_v20 }
  0x7e   : > { %842 = vmatprep.subr.bf16.mxu0 %v841_v23  ;;  %855 = vmatprep.subr.bf16.mxu1 %v841_v23 }
  0x81   : > { %844 = vmatpush3.bf16.msra.mxu0 %v841_v23  ;;  %863 = vmatpush3.bf16.msra.mxu1 %v841_v23  ;;  %v431_v23 = vadd.s32 56, %v1365_v34 }
  0x82   : > { %846 = vmatprep.subr.bf16.mxu0 %v845_v26  ;;  %856 = vmatprep.subr.bf16.mxu1 %v845_v26 }
  0x83   : > { %vm443_vm7 = vcmp.eq.s32.totalorder %v431_v23, %v1377_v38 }
  0x85   : > { %848 = vmatpush3.bf16.msra.mxu0 %v845_v26  ;;  %864 = vmatpush3.bf16.msra.mxu1 %v845_v26 }
  0x88   : > { %806 = vmatmul.mubr.f32.vlgmr.msra.gmra.mrb[0].mxu0 %v285_v27  ;;  %812 = vmatmul.mubr.f32.vlgmr.msra.gmra.mrb[0].mxu1 %v289_v28 }
  0x89   : > { %808 = vmatprep.mubr.f32.mxu0 %v286_v29  ;;  %814 = vmatprep.mubr.f32.mxu1 %v290_v30 }
  0x8c   : > { %809 = vmatmul.mubr.f32.gmra.mrb[2].mxu0 %v287_v31  ;;  %815 = vmatmul.mubr.f32.gmra.mrb[2].mxu1 %v291_v32 }
 0x15b   : > { %v807_v40 = vpop.f32.mrb[0].mxu0  ;;  %v813_v41 = vpop.f32.mrb[0].mxu1 }
 0x15c   : > { %v1380_v42 = vmul.f32 %v807_v40, %v413_v39  ;;  %v1382_v43 = vmul.f32 %v813_v41, %v413_v39  ;;  %v374_v44 = vpop.f32.mrb[1].mxu0  ;;  %v394_v45 = vpop.f32.mrb[1].mxu1 }
 0x15d   : > { %v1386_v46 = vmul.f32 %v413_v39, %v374_v44  ;;  %v1388_v47 = vmul.f32 %v413_v39, %v394_v45 }
 0x15e   : > { %v448_v48 = vsel %vm437_vm0, %v1380_v42, 0.0  ;;  %v535_v49 = vand.u32 2147483647, %v1380_v42  ;;  %v469_v50 = vmax.f32 %v1380_v42, %v1382_v43  ;;  %v539_v51 = vand.u32 2147483647, %v1382_v43 }
 0x15f   : > { %v447_v52 = vsel %vm436_vm1, %v1386_v46, 0.0  ;;  %v810_v53 = vpop.f32.mrb[2].mxu0  ;;  %v816_v54 = vpop.f32.mrb[2].mxu1  ;;  %v534_v59 = vand.u32 2147483647, %v1386_v46  ;;  %v468_v0 = vmax.f32 %v1386_v46, %v1388_v47  ;;  %v451_v28 = vsel %vm440_vm5, %v1388_v47, 0.0 }
 0x160   : > { %v543_v56 = vsub.f32 0.0, %v535_v49  ;;  %v455_v58 = vadd.f32 %v448_v48, %v447_v52  ;;  %v384_v60 = vpop.f32.mrb[3].mxu0  ;;  %v404_v61 = vpop.f32.mrb[3].mxu1  ;;  %v547_v62 = vsub.f32 0.0, %v539_v51  ;;  %v538_v4 = vand.u32 2147483647, %v1388_v47 }
 0x161   : > { %v542_v3 = vsub.f32 0.0, %v534_v59  ;;  %v1404_v5 = vmul.f32 %v810_v53, %v413_v39  ;;  %v472_v6 = vmax.f32 %v468_v0, %v469_v50  ;;  %v1406_v7 = vmul.f32 %v816_v54, %v413_v39 }
 0x162   : > { %v552_v2 = vmul.f32 1.442695, %v543_v56  ;;  %v1408_v8 = vmul.f32 %v413_v39, %v384_v60  ;;  %v560_v9 = vmul.f32 1.442695, %v547_v62  ;;  %v546_v11 = vsub.f32 0.0, %v538_v4 }
 0x163   : > { %v550_v10 = vmul.f32 1.442695, %v542_v3  ;;  %v537_v12 = vand.u32 2147483647, %v1404_v5  ;;  %v471_v14 = vmax.f32 %v1404_v5, %v1406_v7  ;;  %v1420_v20 = vmul.f32 %v413_v39, %v404_v61 }
 0x164   : > { %952 = vpow2.f32 %v552_v2  ;;  %v558_v13 = vmul.f32 1.442695, %v546_v11  ;;  %v449_v16 = vsel %vm438_vm2, %v1408_v8, 0.0  ;;  %v536_v19 = vand.u32 2147483647, %v1408_v8 }
 0x165   : > { %954 = vpow2.f32 %v550_v10  ;;  %v545_v15 = vsub.f32 0.0, %v537_v12  ;;  %v456_v18 = vadd.f32 %v455_v58, %v449_v16  ;;  %v450_v21 = vsel %vm439_vm4, %v1404_v5, 0.0 }
 0x166   : > { %956 = vpow2.f32 %v560_v9  ;;  %v541_v24 = vand.u32 2147483647, %v1406_v7  ;;  %v544_v26 = vsub.f32 0.0, %v536_v19  ;;  %v470_v27 = vmax.f32 %v1408_v8, %v1420_v20 }
 0x167   : > { %958 = vpow2.f32 %v558_v13  ;;  %v556_v22 = vmul.f32 1.442695, %v545_v15  ;;  %v457_v25 = vadd.f32 %v456_v18, %v450_v21  ;;  %v540_v32 = vand.u32 2147483647, %v1420_v20 }
 0x168   : > { %v554_v29 = vmul.f32 1.442695, %v544_v26  ;;  %v473_v31 = vmax.f32 %v470_v27, %v471_v14  ;;  %v452_v33 = vsel %vm441_vm3, %v1382_v43, 0.0  ;;  %v549_v35 = vsub.f32 0.0, %v541_v24 }
 0x169   : > { %960 = vpow2.f32 %v556_v22  ;;  %v458_v30 = vadd.f32 %v457_v25, %v451_v28  ;;  %v453_v41 = vsel %vm442_vm6, %v1420_v20, 0.0  ;;  %v548_v49 = vsub.f32 0.0, %v540_v32 }
 0x16a   : > { %962 = vpow2.f32 %v554_v29  ;;  %v474_v39 = vmax.f32 %v472_v6, %v473_v31  ;;  %v454_v51 = vsel %vm443_vm7, %v1406_v7, 0.0  ;;  %v564_v53 = vmul.f32 1.442695, %v549_v35 }
 0x16b   : > { %v459_v37 = vadd.f32 %v458_v30, %v452_v33  ;;  %v562_v57 = vmul.f32 1.442695, %v548_v49  ;;  %v527_v4 = vmax.f32 %v1380_v42, 0.0  ;;  %v526_v16 = vmax.f32 %v1386_v46, 0.0 }
 0x16c   : > { %v475_v48 = vrot.slane %v474_v39, 4  ;;  %v528_v33 = vmax.f32 %v1408_v8, 0.0 }
 0x16d   : > { %v460_v45 = vadd.f32 %v459_v37, %v453_v41  ;;  %v529_v41 = vmax.f32 %v1404_v5, 0.0 }
 0x16e   : > { %v953_v34 = vpop.eup %952  ;;  %v476_v38 = vmax.f32 %v474_v39, %v475_v48 }
 0x16f   : > { %v567_v40 = vadd.f32 1.0, %v953_v34  ;;  %v955_v44 = vpop.eup %954  ;;  %v1438_v54 = vadd.f32 %v460_v45, %v454_v51 }
 0x170   : > { %v566_v50 = vadd.f32 1.0, %v955_v44  ;;  %v957_v52 = vpop.eup %956  ;;  %v477_v56 = vrot.slane %v476_v38, 2 }
 0x171   : > { %964 = vlog2.f32 %v567_v40  ;;  %v959_v55 = vpop.eup %958  ;;  %v571_v63 = vadd.f32 1.0, %v957_v52 }
 0x172   : > { %966 = vlog2.f32 %v566_v50  ;;  %v570_v59 = vadd.f32 1.0, %v959_v55  ;;  %v478_v61 = vmax.f32 %v476_v38, %v477_v56  ;;  %v530_v50 = vmax.f32 %v1388_v47, 0.0 }
 0x173   : > { %v961_v58 = vpop.eup %960  ;;  %968 = vpow2.f32 %v564_v53  ;;  %v531_v55 = vmax.f32 %v1382_v43, 0.0 }
 0x174   : > { %v569_v60 = vadd.f32 1.0, %v961_v58  ;;  %v963_v62 = vpop.eup %962  ;;  %v479_v0 = vrot.slane %v478_v61, 1  ;;  %970 = vpow2.f32 %v562_v57 }
 0x175   : > { %v568_v1 = vadd.f32 1.0, %v963_v62 }
 0x176   : > { %972 = vlog2.f32 %v569_v60  ;;  %v1440_v2 = vmax.f32 %v478_v61, %v479_v0 }
 0x177   : > { %974 = vlog2.f32 %v570_v59 }
 0x178   : > { %976 = vlog2.f32 %v568_v1  ;;  %v481_v9 = vsub.f32 %v1386_v46, %v1440_v2  ;;  %v482_v10 = vsub.f32 %v1380_v42, %v1440_v2  ;;  %v483_v12 = vsub.f32 %v1408_v8, %v1440_v2 }
 0x179   : > { %978 = vlog2.f32 %v571_v63  ;;  %v484_v13 = vsub.f32 %v1404_v5, %v1440_v2  ;;  %v485_v14 = vsub.f32 %v1388_v47, %v1440_v2  ;;  %v486_v18 = vsub.f32 %v1382_v43, %v1440_v2 }
 0x17a   : > { %v487_v42 = vsub.f32 %v1420_v20, %v1440_v2  ;;  %v488_v19 = vsub.f32 %v1406_v7, %v1440_v2  ;;  %v489_v21 = vmul.f32 1.442695, %v481_v9  ;;  %v491_v24 = vmul.f32 1.442695, %v482_v10 }
 0x17b   : > { %v965_v3 = vpop.eup %964  ;;  %v493_v25 = vmul.f32 1.442695, %v483_v12  ;;  %v495_v46 = vmul.f32 1.442695, %v484_v13  ;;  %v497_v31 = vmul.f32 1.442695, %v485_v14 }
 0x17c   : > { %v577_v6 = vmul.f32 0.6931472, %v965_v3  ;;  %v967_v11 = vpop.eup %966  ;;  %980 = vpow2.f32 %v489_v21  ;;  %v499_v40 = vmul.f32 1.442695, %v486_v18  ;;  %v501_v48 = vmul.f32 1.442695, %v487_v42 }
 0x17d   : > { %v575_v17 = vmul.f32 0.6931472, %v967_v11  ;;  %v969_v22 = vpop.eup %968  ;;  %982 = vpow2.f32 %v491_v24  ;;  %v503_v8 = vmul.f32 1.442695, %v488_v19  ;;  %v462_v3 = vrot.slane %v1438_v54, 4 }
 0x17e   : > { %v591_v15 = vadd.f32 %v577_v6, %v527_v4  ;;  %v971_v26 = vpop.eup %970  ;;  %v573_v29 = vadd.f32 1.0, %v969_v22  ;;  %984 = vpow2.f32 %v493_v25  ;;  %v532_v10 = vmax.f32 %v1420_v20, 0.0 }
 0x17f   : > { %v590_v23 = vadd.f32 %v575_v17, %v526_v16  ;;  %v572_v34 = vadd.f32 1.0, %v971_v26  ;;  %986 = vpow2.f32 %v495_v46  ;;  %v533_v14 = vmax.f32 %v1406_v7, 0.0 }
 0x180   : > { %v973_v28 = vpop.eup %972  ;;  %988 = vlog2.f32 %v573_v29 }
 0x181   : > { %v598_v27 = vadd.f32 %v591_v15, %v590_v23  ;;  %v975_v30 = vpop.eup %974  ;;  %v581_v37 = vmul.f32 0.6931472, %v973_v28  ;;  %990 = vpow2.f32 %v497_v31  ;;  %v463_v15 = vadd.f32 %v462_v3, %v1438_v54 }
 0x182   : > { %v977_v32 = vpop.eup %976  ;;  %v583_v44 = vmul.f32 0.6931472, %v975_v30  ;;  %992 = vlog2.f32 %v572_v34 }
 0x183   : > { %v979_v35 = vpop.eup %978  ;;  %v579_v39 = vmul.f32 0.6931472, %v977_v32  ;;  %v593_v51 = vadd.f32 %v581_v37, %v529_v41  ;;  %994 = vpow2.f32 %v499_v40  ;;  %v464_v22 = vrot.slane %v463_v15, 2  ;;  %v611_v40 = vld [vmem:[#allocation3] sm:$0x1] }
 0x184   : > { %v585_v49 = vmul.f32 0.6931472, %v979_v35  ;;  %v594_v56 = vadd.f32 %v583_v44, %v530_v50  ;;  %996 = vpow2.f32 %v501_v48  ;;  %v1138_v35 = vmov 0.0  }
 0x185   : > { %v592_v45 = vadd.f32 %v579_v39, %v528_v33  ;;  %998 = vpow2.f32 %v503_v8  ;;  %v745_v37 = vsel %vm444_vm8, 1.0, %v1138_v35 }
 0x186   : > { %v981_v53 = vpop.eup %980  ;;  %v595_v59 = vadd.f32 %v585_v49, %v531_v55 }
 0x187   : > { %v599_v52 = vadd.f32 %v598_v27, %v592_v45  ;;  %v983_v38 = vpop.eup %982  ;;  %v465_v27 = vadd.f32 %v464_v22, %v463_v15 }
 0x188   : > { %v505_v5 = vadd.f32 %v983_v38, %v981_v53  ;;  %v985_v58 = vpop.eup %984 }
 0x189   : > { %v600_v57 = vadd.f32 %v599_v52, %v593_v51  ;;  %v987_v62 = vpop.eup %986  ;;  %v466_v30 = vrot.slane %v465_v27, 1  ;;  %v521_v51 = vld [vmem:[#allocation2] sm:$0x1] }
 0x18a   : > { %v506_v61 = vadd.f32 %v985_v58, %v505_v5  ;;  %v989_v63 = vpop.eup %988 }
 0x18b   : > { %v601_v60 = vadd.f32 %v600_v57, %v594_v56  ;;  %v991_v1 = vpop.eup %990  ;;  %v589_v43 = vmul.f32 0.6931472, %v989_v63  ;;  %v467_v33 = vadd.f32 %v466_v30, %v465_v27 }
 0x18c   : > { %v507_v0 = vadd.f32 %v987_v62, %v506_v61  ;;  %v993_v4 = vpop.eup %992 }
 0x18d   : > { %v602_v47 = vadd.f32 %v601_v60, %v595_v59  ;;  %v995_v9 = vpop.eup %994  ;;  %v587_v11 = vmul.f32 0.6931472, %v993_v4  ;;  %v597_v42 = vadd.f32 %v589_v43, %v533_v14 }
 0x18e   : > { %v508_v6 = vadd.f32 %v991_v1, %v507_v0  ;;  %v997_v13 = vpop.eup %996 }
 0x18f   : > { %v596_v16 = vadd.f32 %v587_v11, %v532_v10  ;;  %v999_v18 = vpop.eup %998 }
 0x190   : > { %v509_v12 = vadd.f32 %v995_v9, %v508_v6 }
 0x191   : > { %v603_v19 = vadd.f32 %v602_v47, %v596_v16 }
 0x192   : > { %v510_v17 = vadd.f32 %v997_v13, %v509_v12 }
 0x193   : > { %v604_v23 = vadd.f32 %v603_v19, %v597_v42 }
 0x194   : > { %v511_v21 = vadd.f32 %v999_v18, %v510_v17 }
 0x195   : > { %v605_v25 = vrot.slane %v604_v23, 4 }
 0x196   : > { %v512_v24 = vrot.slane %v511_v21, 4 }
 0x197   : > { %v606_v20 = vadd.f32 %v605_v25, %v604_v23 }
 0x198   : > { %v513_v26 = vadd.f32 %v512_v24, %v511_v21 }
 0x199   : > { %v607_v28 = vrot.slane %v606_v20, 2 }
 0x19a   : > { %v514_v46 = vrot.slane %v513_v26, 2 }
 0x19b   : > { %v608_v7 = vadd.f32 %v607_v28, %v606_v20 }
 0x19c   : > { %v515_v29 = vadd.f32 %v514_v46, %v513_v26 }
 0x19d   : > { %v609_v54 = vrot.slane %v608_v7, 1 }
 0x19e   : > { %v516_v31 = vrot.slane %v515_v29, 1 }
 0x19f   : > { %v610_v34 = vadd.f32 %v609_v54, %v608_v7 }
 0x1a0   : > { %v517_v32 = vadd.f32 %v516_v31, %v515_v29 }
 0x1a1   : > { %v612_v39 = vsub.f32 %v610_v34, %v467_v33 }
 0x1a2   : > { %1000 = vlog2.f32 %v517_v32 }
 0x1a3   : > { %v613_v41 = vmul.f32 %v745_v37, %v612_v39 }
 0x1a5   : > { %v614_v44 = vadd.f32 %v613_v41, %v611_v40 }
 0x1a7   : > { %615 = vst [vmem:[#allocation3] sm:$0x1] %v614_v44 }
 0x1ac   : > { %v1001_v45 = vpop.eup %1000 }
 0x1ad   : > { %v519_v48 = vmul.f32 0.6931472, %v1001_v45 }
 0x1ae   : > { %v625_v53 = vld [vmem:[#allocation3] sm:$0x1] (!%p746_p11) }
 0x1af   : > { %v520_v49 = vadd.f32 %v519_v48, %v1440_v2  ;;  %v626_v55 = vsel (!%p746_p11), %vm621_vm9, %v625_v53, 0.0 }
 0x1b1   : > { %v522_v50 = vsub.f32 %v520_v49, %v467_v33  ;;  %619 = sbr.rel (%p746_p11) target bundleno = 601 (0x259), region = 52 }
 0x1b3   : > { %v523_v52 = vmul.f32 %v745_v37, %v522_v50 }
 0x1b5   : > { %v524_v36 = vadd.f32 %v523_v52, %v521_v51 }
 0x1b7   : > { %525 = vst [vmem:[#allocation2] sm:$0x1] %v524_v36 }
 0x1be   : > { %v620_v8 = vld [vmem:[#allocation2] sm:$0x1] }
 0x1bf   : > { %v622_v38 = vsel %vm621_vm9, %v620_v8, 0.0 }
 0x1c0   : > { %623 = vadd.xlane.f32.xlu0 %v622_v38 }
 0x1c4   : > { %627 = vadd.xlane.f32.xlu0 %v626_v55 }
 0x24d   : > { %v624_v56 = vpop.xlane.xlu0 %623 }
 0x24e   : > { %v629_v5 = vmul.f32 0.003125, %v624_v56 }
 0x251   : > { %v628_v57 = vpop.xlane.xlu0 %627 }
 0x252   : > { %v630_v2 = vmul.f32 4.8828126e-05, %v628_v57 }
 0x254   : > { %v631_v58 = vadd.f32 %v630_v2, %v629_v5 }
 0x256   : > { %v632_v59 = vmul.f32 0.5, %v631_v58 }
 0x258   : > { %634 = vst.msk [vmem:[%s276_s11] sm:$0x1] %vm633_vm10, %v632_v59 }
 0x259 PF: > { %s19_s24 = sadd.s32 1, %s1130_s24   ;;  %s1522_s17 = smov %s1106_s18 }
 0x25a   : > { %p16_p3 = scmp.ge.s32.totalorder %s19_s24, 6   ;;  %s1523_s18 = smov %s1110_s19 }
 0x25b   : > { %s1524_s19 = smov %s1317_s7  ;;  %s1525_s20 = smov %s1122_s22 }
 0x25c   : > { %s1526_s21 = smov %s1126_s23  ;;  %s1527_s22 = smov %s1530_s0 }
 0x25d   : > { %s1528_s23 = smov %s1534_s6  ;;  %18 = sbr.rel (!%p16_p3) target bundleno = 8 (0x8), region = 92 }
 0x264   :  { %652 = vsyncpa [#allocation6], 1 }
 0x265   :  { %654 = vsyncpa [#allocation6 + $0x1], 1 }
 0x266   :  { %655 = vsyncpa [#allocation8], 1 }
 0x267   :  { %657 = vsyncpa [#allocation8 + $0x1], 1 }

</bundles_post_ra>
